<compile_context>
chip_gen: v6e
topology: v6e:2x2x1
jax: 0.10.0
libtpu: 0.0.40
codegen_flags: <defaults>
</compile_context>

<pallas_src>
from typing import NamedTuple

import jax
import jax.numpy as jnp
from jax.experimental import pallas as pl
from jax.experimental.pallas import tpu as pltpu

_LANE = 128          # lane width for dense input/output slabs
_TILE_B_MAX = 2048   # rows per grid step (amortizes per-step overhead on v5e/v6e)
_SPLIT_B = 512       # above this, force >=2 grid steps so v7x megacore can split batch


def _round_up(x, m):
    return ((x + m - 1) // m) * m


class PackedMeta(NamedTuple):
    """Static (hashable) layout info for the packed parameter slabs."""
    d_all: int          # text_dim + audio_dim + video_dim
    d_pad: int          # d_all rounded up to 128 lanes
    hidden: int
    num_classes: int
    w_rows: tuple       # row offsets of (w1, w2, w_feat, wf2, w_out) in the weight slab


# --------------------------------------------------------------------------- #
# Kernel: entire MultiModalMLP forward on one batch tile.
# --------------------------------------------------------------------------- #
def _make_kernel(meta: PackedMeta):
    d_pad = meta.d_pad
    H, C = meta.hidden, meta.num_classes
    F = H // 2
    threeH, threeF, threeC = 3 * H, 3 * F, 3 * C
    r1, r2, rf, r3, r4 = meta.w_rows

    def kernel(x_ref, w_ref, b_ref, out_ref):
        x = x_ref[...]                                           # [TB, d_pad] bf16

        # Static slices of the single VMEM-resident weight slab (zero runtime cost).
        w1 = w_ref[r1:r1 + d_pad, 0:threeH]                      # block-diag modal L1
        w2 = w_ref[r2:r2 + threeH, 0:threeF]                     # block-diag modal L2
        w_feat = w_ref[rf:rf + threeF, 0:threeC + H]             # [Wc_bd | Wf1] fused
        wf2 = w_ref[r3:r3 + H, 0:F]                              # fusion L2
        w_out = w_ref[r4:r4 + F, 0:F + C]                        # [I_F | Wfc] fused

        # Modality MLPs as block-diagonal matmuls (Dropout == identity at eval).
        h = jnp.dot(x, w1, preferred_element_type=jnp.float32) + b_ref[0:1, 0:threeH]
        h = jnp.maximum(h, 0.0)
        feat = (jnp.dot(h.astype(jnp.bfloat16), w2, preferred_element_type=jnp.float32)
                + b_ref[1:2, 0:threeF])
        feat = jnp.maximum(feat, 0.0)            # == cat([text_f, audio_f, video_f], dim=1)

        # One matmul produces [modal logits | fusion hidden]; ReLU only on the hidden part.
        t = (jnp.dot(feat.astype(jnp.bfloat16), w_feat, preferred_element_type=jnp.float32)
             + b_ref[2:3, 0:threeC + H])
        modal_logits = t[:, 0:threeC]                            # text | audio | video
        fh = jnp.maximum(t[:, threeC:threeC + H], 0.0)

        fused = (jnp.dot(fh.astype(jnp.bfloat16), wf2, preferred_element_type=jnp.float32)
                 + b_ref[3:4, 0:F])
        fused = jnp.maximum(fused, 0.0)                          # fused_features

        # Identity-augmented classifier: one matmul emits [fused | logits].
        u = (jnp.dot(fused.astype(jnp.bfloat16), w_out, preferred_element_type=jnp.float32)
             + b_ref[4:5, 0:F + C])

        payload = (F + C) + threeC
        pieces = [u, modal_logits]
        pad_w = out_ref.shape[1] - payload
        if pad_w > 0:
            pieces.append(jnp.zeros((x.shape[0], pad_w), jnp.float32))
        out_ref[...] = jnp.concatenate(pieces, axis=1)           # single full-width store

    return kernel


# --------------------------------------------------------------------------- #
# Wrapper: input packing, grid, BlockSpecs, slicing the output slab.
# --------------------------------------------------------------------------- #
def multimodal_mlp_forward(meta: PackedMeta, w_slab, b_slab, text_x, audio_x, video_x):
    B = text_x.shape[0]
    H, C = meta.hidden, meta.num_classes
    F, threeC = H // 2, 3 * C
    payload = (F + C) + threeC
    out_w = _round_up(payload, _LANE)

    # Batch tiling (multiples of 16 for bf16 sublane packing).
    b_need = _round_up(max(B, 1), 16)
    if b_need <= _SPLIT_B:
        tile_b = b_need                                   # one step, tiny batch
    else:
        tile_b = min(_TILE_B_MAX, _round_up((b_need + 1) // 2, 16))  # >=2 steps (megacore)
    b_pad = _round_up(b_need, tile_b)

    # Pack inputs ONCE in the wrapper: one lane-dense bf16 stream (zero-padded lanes
    # multiply zero weight rows, padded batch rows are sliced off below).
    x = jnp.concatenate([text_x, audio_x, video_x], axis=1)          # [B, d_all]
    x = jnp.pad(x, ((0, b_pad - B), (0, meta.d_pad - meta.d_all))).astype(jnp.bfloat16)

    grid = (b_pad // tile_b,)
    slab = pl.pallas_call(
        _make_kernel(meta),
        out_shape=jax.ShapeDtypeStruct((b_pad, out_w), jnp.float32),
        grid=grid,
        in_specs=[pl.BlockSpec((tile_b, meta.d_pad), lambda i: (i, 0)),   # activations
                  pl.BlockSpec(w_slab.shape, lambda i: (0, 0)),           # weights (resident)
                  pl.BlockSpec(b_slab.shape, lambda i: (0, 0))],          # biases (resident)
        out_specs=pl.BlockSpec((tile_b, out_w), lambda i: (i, 0)),
        compiler_params=pltpu.CompilerParams(dimension_semantics=("parallel",)),
    )(x, w_slab, b_slab)

    # One payload slice; the sub-slices below are fused by XLA under jit.
    slab = slab[:B, :payload]
    fused_features = slab[:, 0:F]
    logits = slab[:, F:F + C]
    modal_outputs = {
        "text": slab[:, F + C:F + 2 * C],
        "audio": slab[:, F + 2 * C:F + 3 * C],
        "video": slab[:, F + 3 * C:F + 4 * C],
    }
    return logits, modal_outputs, fused_features


# --------------------------------------------------------------------------- #
# Parameter init / packing (packing is done ONCE, outside the forward).
# --------------------------------------------------------------------------- #
def init_linear(key, d_in, d_out):
    """Linear params; weight stored [d_in, d_out] (torch weight.T), bias [1, d_out]."""
    kw, kb = jax.random.split(key)
    bound = 1.0 / jnp.sqrt(jnp.float32(d_in))
    w = jax.random.uniform(kw, (d_in, d_out), jnp.float32, -bound, bound)
    b = jax.random.uniform(kb, (1, d_out), jnp.float32, -bound, bound)
    return w, b


def init_modal_mlp(key, d_in, hidden, num_classes):
    k1, k2, k3 = jax.random.split(key, 3)
    w1, b1 = init_linear(k1, d_in, hidden)
    w2, b2 = init_linear(k2, hidden, hidden // 2)
    wc, bc = init_linear(k3, hidden // 2, num_classes)
    return dict(w1=w1, b1=b1, w2=w2, b2=b2, wc=wc, bc=bc)


def init_fusion(key, hidden, num_classes):
    k1, k2, k3 = jax.random.split(key, 3)
    w1, b1 = init_linear(k1, (hidden // 2) * 3, hidden)
    w2, b2 = init_linear(k2, hidden, hidden // 2)
    wc, bc = init_linear(k3, hidden // 2, num_classes)
    return dict(w1=w1, b1=b1, w2=w2, b2=b2, wc=wc, bc=bc)


def _block_diag(mats):
    rows = sum(m.shape[0] for m in mats)
    cols = sum(m.shape[1] for m in mats)
    out = jnp.zeros((rows, cols), mats[0].dtype)
    r = c = 0
    for m in mats:
        out = out.at[r:r + m.shape[0], c:c + m.shape[1]].set(m)
        r += m.shape[0]
        c += m.shape[1]
    return out


def pack_multimodal_params(params):
    """Pack everything ONCE: one bf16 weight slab + one f32 bias slab + static layout."""
    mods = [params["text"], params["audio"], params["video"]]
    fus = params["fusion"]
    dims = tuple(m["w1"].shape[0] for m in mods)
    H = fus["w1"].shape[1]
    F = H // 2
    C = fus["bc"].shape[1]
    d_all = sum(dims)
    d_pad = _round_up(d_all, _LANE)

    # Block-diagonal modality weights (text|audio|video order).
    w1_bd = jnp.pad(_block_diag([m["w1"] for m in mods]), ((0, d_pad - d_all), (0, 0)))
    w2_bd = _block_diag([m["w2"] for m in mods])
    wc_bd = _block_diag([m["wc"] for m in mods])
    # Fuse the two matmuls that read `feat`: [Wc_bd | Wf1].
    w_feat = jnp.concatenate([wc_bd, fus["w1"]], axis=1)
    # Identity-augment the classifier so one matmul emits [fused | logits].
    w_out = jnp.concatenate([jnp.eye(F, dtype=jnp.float32), fus["wc"]], axis=1)

    mats = [w1_bd, w2_bd, w_feat, fus["w2"], w_out]
    col_w = _round_up(max(m.shape[1] for m in mats), _LANE)
    row_offs, r = [], 0
    for m in mats:
        row_offs.append(r)
        r += _round_up(m.shape[0], 16)          # bf16 sublane-pair aligned regions
    rows = _round_up(r, 16)
    w_slab = jnp.zeros((rows, col_w), jnp.float32)
    for off, m in zip(row_offs, mats):
        w_slab = w_slab.at[off:off + m.shape[0], :m.shape[1]].set(m)
    w_slab = w_slab.astype(jnp.bfloat16)        # native bf16 MXU path, half the HBM read

    # Biases: one f32 slab, one row per stage.
    b_rows = [
        jnp.concatenate([m["b1"] for m in mods], axis=1),                      # [1, 3H]
        jnp.concatenate([m["b2"] for m in mods], axis=1),                      # [1, 3F]
        jnp.concatenate([m["bc"] for m in mods] + [fus["b1"]], axis=1),        # [1, 3C+H]
        fus["b2"],                                                             # [1, F]
        jnp.concatenate([jnp.zeros((1, F), jnp.float32), fus["bc"]], axis=1),  # [1, F+C]
    ]
    bw = _round_up(max(b.shape[1] for b in b_rows), _LANE)
    b_slab = jnp.zeros((8, bw), jnp.float32)
    for i, b in enumerate(b_rows):
        b_slab = b_slab.at[i, :b.shape[1]].set(b[0])

    meta = PackedMeta(d_all=d_all, d_pad=d_pad, hidden=H, num_classes=C,
                      w_rows=tuple(row_offs))
    return w_slab, b_slab, meta


# --------------------------------------------------------------------------- #
# Demo + correctness check
# --------------------------------------------------------------------------- #
def _reference(params, tx, ax, vx):
    def blk(x, p):
        h = jnp.maximum(x @ p["w1"] + p["b1"], 0.0)
        f = jnp.maximum(h @ p["w2"] + p["b2"], 0.0)
        return f @ p["wc"] + p["bc"], f
    tl, tf = blk(tx, params["text"])
    al, af = blk(ax, params["audio"])
    vl, vf = blk(vx, params["video"])
    cat = jnp.concatenate([tf, af, vf], axis=1)
    rl, rfeat = blk(cat, params["fusion"])
    return rl, {"text": tl, "audio": al, "video": vl}, rfeat


def _check(out, ref, atol=5e-2, rtol=5e-2):
    # bf16 weights/activations with f32 accumulation -> ~1e-2 relative vs f32 reference.
    logits, modal, fused = out
    rlogits, rmodal, rfused = ref
    assert jnp.allclose(logits, rlogits, atol=atol, rtol=rtol)
    assert jnp.allclose(fused, rfused, atol=atol, rtol=rtol)
    for k in ("text", "audio", "video"):
        assert jnp.allclose(modal[k], rmodal[k], atol=atol, rtol=rtol)


if __name__ == "__main__":
    # opt.input_dims = [16, 12, <unused>, 20], opt.hidden_dim = 32, opt.num_classes = 4,
    # opt.dropout -> eval mode (identity).
    batch = 2
    text_dim, audio_dim, video_dim = 16, 12, 20
    hidden, num_classes = 32, 4

    root = jax.random.PRNGKey(0)
    k_params, k_text, k_audio, k_video, k_big = jax.random.split(root, 5)
    kt, ka, kv, kfu = jax.random.split(k_params, 4)

    params = {
        "text": init_modal_mlp(kt, text_dim, hidden, num_classes),
        "audio": init_modal_mlp(ka, audio_dim, hidden, num_classes),
        "video": init_modal_mlp(kv, video_dim, hidden, num_classes),
        "fusion": init_fusion(kfu, hidden, num_classes),
    }
    w_slab, b_slab, meta = pack_multimodal_params(params)     # packed once at init
    w_slab, b_slab = jax.block_until_ready((w_slab, b_slab))

    text_x = jax.random.normal(k_text, (batch, text_dim), jnp.float32)
    audio_x = jax.random.normal(k_audio, (batch, audio_dim), jnp.float32)
    video_x = jax.random.normal(k_video, (batch, video_dim), jnp.float32)

    fwd = jax.jit(multimodal_mlp_forward, static_argnums=0)
    out = fwd(meta, w_slab, b_slab, text_x, audio_x, video_x)
    jax.block_until_ready(out)
    _check(out, _reference(params, text_x, audio_x, video_x))

    # Secondary sanity check: larger batch exercises the multi-step ("parallel") grid path.
    kb_t, kb_a, kb_v = jax.random.split(k_big, 3)
    big_t = jax.random.normal(kb_t, (600, text_dim), jnp.float32)
    big_a = jax.random.normal(kb_a, (600, audio_dim), jnp.float32)
    big_v = jax.random.normal(kb_v, (600, video_dim), jnp.float32)
    out_big = fwd(meta, w_slab, b_slab, big_t, big_a, big_v)
    jax.block_until_ready(out_big)
    _check(out_big, _reference(params, big_t, big_a, big_v))

    print("KERNEL_OK")
</pallas_src>

<mosaic_0001>
module attributes {stable_mosaic.version = 11 : i64} {
  func.func @kernel(%arg0: i32, %arg1: memref<16x128xbf16, #tpu.memory_space<vmem>>, %arg2: memref<320x128xbf16, #tpu.memory_space<vmem>>, %arg3: memref<8x128xf32, #tpu.memory_space<vmem>>, %arg4: memref<16x128xf32, #tpu.memory_space<vmem>>) attributes {dimension_semantics = [#tpu.dimension_semantics<parallel>], iteration_bounds = array<i64: 1>, scalar_prefetch = 0 : i64, scratch_operands = 0 : i64, tpu.core_type = #tpu.core_type<tc>, window_params = [{transform_indices = @transform_0, window_bounds = array<i64: 16, 128>}, {pipeline_mode = #tpu.pipeline_mode<synchronous>, transform_indices = @transform_1, window_bounds = array<i64: 320, 128>}, {pipeline_mode = #tpu.pipeline_mode<synchronous>, transform_indices = @transform_2, window_bounds = array<i64: 8, 128>}, {transform_indices = @transform_3, window_bounds = array<i64: 16, 128>}]} {
    %c0 = arith.constant 0 : index
    %c0_0 = arith.constant 0 : index
    %0 = vector.load %arg1[%c0, %c0_0] : memref<16x128xbf16, #tpu.memory_space<vmem>>, vector<16x128xbf16>
    %c0_1 = arith.constant 0 : index
    %c0_2 = arith.constant 0 : index
    %1 = vector.load %arg2[%c0_1, %c0_2] : memref<320x128xbf16, #tpu.memory_space<vmem>>, vector<128x96xbf16>
    %c128 = arith.constant 128 : index
    %c0_3 = arith.constant 0 : index
    %2 = vector.load %arg2[%c128, %c0_3] : memref<320x128xbf16, #tpu.memory_space<vmem>>, vector<96x48xbf16>
    %c224 = arith.constant 224 : index
    %c0_4 = arith.constant 0 : index
    %3 = vector.load %arg2[%c224, %c0_4] : memref<320x128xbf16, #tpu.memory_space<vmem>>, vector<48x44xbf16>
    %c272 = arith.constant 272 : index
    %c0_5 = arith.constant 0 : index
    %4 = vector.load %arg2[%c272, %c0_5] : memref<320x128xbf16, #tpu.memory_space<vmem>>, vector<32x16xbf16>
    %c304 = arith.constant 304 : index
    %c0_6 = arith.constant 0 : index
    %5 = vector.load %arg2[%c304, %c0_6] : memref<320x128xbf16, #tpu.memory_space<vmem>>, vector<16x20xbf16>
    %cst = arith.constant dense<0.000000e+00> : vector<16x96xf32>
    %6 = tpu.matmul %0, %1, %cst {dimension_numbers = #tpu.dot_dimension_numbers<[1], [0], [0], [1], [0, 0, 1, 1], [], []>} : vector<16x128xbf16>, vector<128x96xbf16>, vector<16x96xf32> -> vector<16x96xf32>
    %c0_7 = arith.constant 0 : index
    %c0_8 = arith.constant 0 : index
    %7 = vector.load %arg3[%c0_7, %c0_8] : memref<8x128xf32, #tpu.memory_space<vmem>>, vector<1x96xf32>
    %8 = vector.broadcast %7 : vector<1x96xf32> to vector<16x96xf32>
    %9 = arith.addf %6, %8 : vector<16x96xf32>
    %cst_9 = arith.constant 0.000000e+00 : f32
    %10 = vector.broadcast %cst_9 : f32 to vector<16x96xf32>
    %11 = arith.maximumf %9, %10 : vector<16x96xf32>
    %12 = arith.truncf %11 : vector<16x96xf32> to vector<16x96xbf16>
    %cst_10 = arith.constant dense<0.000000e+00> : vector<16x48xf32>
    %13 = tpu.matmul %12, %2, %cst_10 {dimension_numbers = #tpu.dot_dimension_numbers<[1], [0], [0], [1], [0, 0, 1, 1], [], []>} : vector<16x96xbf16>, vector<96x48xbf16>, vector<16x48xf32> -> vector<16x48xf32>
    %c1 = arith.constant 1 : index
    %c0_11 = arith.constant 0 : index
    %14 = vector.load %arg3[%c1, %c0_11] : memref<8x128xf32, #tpu.memory_space<vmem>>, vector<1x48xf32>
    %15 = vector.broadcast %14 : vector<1x48xf32> to vector<16x48xf32>
    %16 = arith.addf %13, %15 : vector<16x48xf32>
    %cst_12 = arith.constant 0.000000e+00 : f32
    %17 = vector.broadcast %cst_12 : f32 to vector<16x48xf32>
    %18 = arith.maximumf %16, %17 : vector<16x48xf32>
    %19 = arith.truncf %18 : vector<16x48xf32> to vector<16x48xbf16>
    %cst_13 = arith.constant dense<0.000000e+00> : vector<16x44xf32>
    %20 = tpu.matmul %19, %3, %cst_13 {dimension_numbers = #tpu.dot_dimension_numbers<[1], [0], [0], [1], [0, 0, 1, 1], [], []>} : vector<16x48xbf16>, vector<48x44xbf16>, vector<16x44xf32> -> vector<16x44xf32>
    %c2 = arith.constant 2 : index
    %c0_14 = arith.constant 0 : index
    %21 = vector.load %arg3[%c2, %c0_14] : memref<8x128xf32, #tpu.memory_space<vmem>>, vector<1x44xf32>
    %22 = vector.broadcast %21 : vector<1x44xf32> to vector<16x44xf32>
    %23 = arith.addf %20, %22 : vector<16x44xf32>
    %24 = vector.extract_strided_slice %23 {offsets = [0, 0], sizes = [16, 12], strides = [1, 1]} : vector<16x44xf32> to vector<16x12xf32>
    %25 = vector.extract_strided_slice %23 {offsets = [0, 12], sizes = [16, 32], strides = [1, 1]} : vector<16x44xf32> to vector<16x32xf32>
    %cst_15 = arith.constant 0.000000e+00 : f32
    %26 = vector.broadcast %cst_15 : f32 to vector<16x32xf32>
    %27 = arith.maximumf %25, %26 : vector<16x32xf32>
    %28 = arith.truncf %27 : vector<16x32xf32> to vector<16x32xbf16>
    %cst_16 = arith.constant dense<0.000000e+00> : vector<16x16xf32>
    %29 = tpu.matmul %28, %4, %cst_16 {dimension_numbers = #tpu.dot_dimension_numbers<[1], [0], [0], [1], [0, 0, 1, 1], [], []>} : vector<16x32xbf16>, vector<32x16xbf16>, vector<16x16xf32> -> vector<16x16xf32>
    %c3 = arith.constant 3 : index
    %c0_17 = arith.constant 0 : index
    %30 = vector.load %arg3[%c3, %c0_17] : memref<8x128xf32, #tpu.memory_space<vmem>>, vector<1x16xf32>
    %31 = vector.broadcast %30 : vector<1x16xf32> to vector<16x16xf32>
    %32 = arith.addf %29, %31 : vector<16x16xf32>
    %cst_18 = arith.constant 0.000000e+00 : f32
    %33 = vector.broadcast %cst_18 : f32 to vector<16x16xf32>
    %34 = arith.maximumf %32, %33 : vector<16x16xf32>
    %35 = arith.truncf %34 : vector<16x16xf32> to vector<16x16xbf16>
    %cst_19 = arith.constant dense<0.000000e+00> : vector<16x20xf32>
    %36 = tpu.matmul %35, %5, %cst_19 {dimension_numbers = #tpu.dot_dimension_numbers<[1], [0], [0], [1], [0, 0, 1, 1], [], []>} : vector<16x16xbf16>, vector<16x20xbf16>, vector<16x20xf32> -> vector<16x20xf32>
    %c4 = arith.constant 4 : index
    %c0_20 = arith.constant 0 : index
    %37 = vector.load %arg3[%c4, %c0_20] : memref<8x128xf32, #tpu.memory_space<vmem>>, vector<1x20xf32>
    %38 = vector.broadcast %37 : vector<1x20xf32> to vector<16x20xf32>
    %39 = arith.addf %36, %38 : vector<16x20xf32>
    %cst_21 = arith.constant 0.000000e+00 : f32
    %40 = vector.broadcast %cst_21 : f32 to vector<16x96xf32>
    %41 = tpu.concatenate %39, %24, %40 in 1 : vector<16x20xf32>, vector<16x12xf32>, vector<16x96xf32> -> vector<16x128xf32>
    %c0_22 = arith.constant 0 : index
    %c0_23 = arith.constant 0 : index
    %42 = vector.load %arg4[%c0_22, %c0_23] : memref<16x128xf32, #tpu.memory_space<vmem>>, vector<16x128xf32>
    tpu.vector_store %arg4[%c0_22, %c0_23], %41 {strides = array<i32>} : memref<16x128xf32, #tpu.memory_space<vmem>>, vector<16x128xf32>,
    return
  }
  func.func @transform_0(%arg0: i32) -> (i32, i32) {
    %c0_i32 = arith.constant 0 : i32
    %c0_i32_0 = arith.constant 0 : i32
    return %arg0, %c0_i32 : i32, i32
  }
  func.func @transform_1(%arg0: i32) -> (i32, i32) {
    %c0_i32 = arith.constant 0 : i32
    %c0_i32_0 = arith.constant 0 : i32
    %c0_i32_1 = arith.constant 0 : i32
    return %c0_i32, %c0_i32_0 : i32, i32
  }
  func.func @transform_2(%arg0: i32) -> (i32, i32) {
    %c0_i32 = arith.constant 0 : i32
    %c0_i32_0 = arith.constant 0 : i32
    %c0_i32_1 = arith.constant 0 : i32
    return %c0_i32, %c0_i32_0 : i32, i32
  }
  func.func @transform_3(%arg0: i32) -> (i32, i32) {
    %c0_i32 = arith.constant 0 : i32
    %c0_i32_0 = arith.constant 0 : i32
    return %arg0, %c0_i32 : i32, i32
  }
}

</mosaic_0001>

<bundles_post_ra>
// kernel: multimodal_mlp_forward.1
= control target key start
LH: loop header
LB: loop body
LE: loop exit
PB: predicated region body
PF: predicated region fallthrough
CT: control target
= control target key end

     0   :  { %8 = vsyncpa [#allocation3], 0  ;;  %s643_s12 = smov [#allocation2]   ;;  %s730_s0 = inlined_call_operand.vmem [shape: bf16[16,128], index: 0, kind: input, shape index: {}]   ;;  %s731_s1 = inlined_call_operand.hbm [shape: bf16[320,128], index: 1, kind: input, shape index: {}]   ;;  %s732_s2 = inlined_call_operand.vmem [shape: f32[8,128], index: 2, kind: input, shape index: {}]   ;;  %s733_s3 = inlined_call_operand.vmem [shape: f32[16,128], index: 3, kind: output, shape index: {}]  }
   0x1   :  { %s16_s13 = sshll.u32 %s643_s12, 4  ;;  %s17_s13 = int_to_ptr.vmem [resolvable:$true] %s16_s13 }
   0x2   :  { %s629_s14 = scalar_lea.vmem %s17_s13, 2560  ;;  %p634_p1 = scmp.lt.s32.totalorder %s17_s13, %s17_s13 }
   0x3   :  { %p630_p0 = scmp.ne.s32.totalorder %s17_s13, %s629_s14  ;;  %p635_p2 = scmp.lt.s32.totalorder %s629_s14, %s629_s14 }
   0x5   :  { %p636_p3 = por %p635_p2, %p634_p1 }
   0x7   :  { %p637_p4 = pnand %p636_p3, %p630_p0 }
   0x9   :  { %640 = shalt.err (!%p637_p4)
}
   0xa   :  { %s644_s15 = smov 64   ;;  %s645_s16 = smov 4  }
   0xb   :  { %22 = dma.hbm_to_vmem [thread:$0]  %s731_s1, 2560, %s17_s13, [#allocation3], %s644_s15, %s644_s15, %s645_s16  }
   0xc   :  { %641 = dma.done.wait [#allocation3], 2560  }
   0xd   :  { %642 = vsyncadd [#allocation3], 4294964736  ;;  %v646_v0 = vmov 0.0   ;;  %vm647_vm0 = vmmov 0   ;;  %v600_v1 = vld [vmem:[#allocation2 + $0x38] sm:$0xff]   ;;  %v601_v2 = vld [vmem:[#allocation2 + $0x30] sm:$0xff]  }
   0xe   :  { %533 = vmatprep.subr.bf16.mxu0 %v646_v0  ;;  %549 = vmatprep.mubr.msk.bf16.mxu0 %vm647_vm0, %v646_v0  ;;  %v602_v3 = vld [vmem:[#allocation2 + $0x28] sm:$0xff]   ;;  %v603_v5 = vld [vmem:[#allocation2 + $0x20] sm:$0xff]   ;;  %v604_v7 = vld [vmem:[#allocation2 + $0x18] sm:$0xff]   ;;  %vm215_vm1 = vcmask 785408   ;;  %vm286_vm2 = vcmask 392192   ;;  %s648_s25 = smov 20  }
   0xf   :  { %553 = vmatprep.subr.bf16.mxu1 %v646_v0  ;;  %565 = vmatprep.mubr.msk.bf16.mxu1 %vm647_vm0, %v646_v0  ;;  %v609_v4 = vld [vmem:[#allocation2 + $0x68] sm:$0xff]   ;;  %v610_v6 = vld [vmem:[#allocation2 + $0x60] sm:$0xff]   ;;  %v611_v8 = vld [vmem:[#allocation2 + $0x58] sm:$0xff]   ;;  %s649_s26 = smov 116   ;;  %vm354_vm3 = vcmask 261120   ;;  %vm413_vm4 = vcmask 130048  }
  0x10   :  { %534 = vmatpush3.bf16.msra.mxu0 %v600_v1  ;;  %554 = vmatpush3.bf16.msra.mxu1 %v609_v4  ;;  %v605_v9 = vld [vmem:[#allocation2 + $0x10] sm:$0xff]   ;;  %v606_v10 = vld [vmem:[#allocation2 + $0x8] sm:$0xff]   ;;  %v607_v11 = vld [vmem:[#allocation2] sm:$0xff]   ;;  %vm466_vm5 = vcmask 162816  }
  0x11   :  { %535 = vmatprep.subr.bf16.mxu0 %v646_v0  ;;  %555 = vmatprep.subr.bf16.mxu1 %v646_v0  ;;  %v608_v12 = vld [vmem:[%s730_s0] sm:$0xff]   ;;  %v612_v13 = vld [vmem:[#allocation2 + $0x50] sm:$0xff]   ;;  %v613_v14 = vld [vmem:[#allocation2 + $0x48] sm:$0xff]  }
  0x12   :  { %v614_v15 = vld [vmem:[#allocation2 + $0x40] sm:$0xff]   ;;  %v616_v27 = vld [vmem:[#allocation2 + $0x78] sm:$0xff]   ;;  %v617_v28 = vld [vmem:[#allocation2 + $0x70] sm:$0xff]  }
  0x13   :  { %v478_v16 = vld [vmem:[%s732_s2] ss:$0 sm:$0xff]  ;;  %v488_v29 = vld [vmem:[%s732_s2 + $0x1] ss:$0 sm:$0xff]  ;;  %v618_v39 = vld [vmem:[#allocation2 + $0x90] sm:$0xff]  }
  0x14   :  { %536 = vmatpush3.bf16.msra.mxu0 %v601_v2  ;;  %556 = vmatpush3.bf16.msra.mxu1 %v610_v6  ;;  %v615_v26 = vld [vmem:[#allocation2 + $0x80] sm:$0xff]   ;;  %v619_v40 = vld [vmem:[#allocation2 + $0x88] sm:$0xff]   ;;  %v620_v52 = vld [vmem:[#allocation2 + $0x98] sm:$0xff]  }
  0x15   :  { %537 = vmatprep.subr.bf16.mxu0 %v646_v0  ;;  %557 = vmatprep.subr.bf16.mxu1 %v646_v0  ;;  %v496_v41 = vld [vmem:[%s732_s2 + $0x2] ss:$0 sm:$0xff]  ;;  %v501_v53 = vld [vmem:[%s732_s2 + $0x3] ss:$0 sm:$0xff]  ;;  %v505_v63 = vld [vmem:[%s732_s2 + $0x4] ss:$0 sm:$0xff] }
  0x18   :  { %538 = vmatpush3.bf16.msra.mxu0 %v602_v3  ;;  %558 = vmatpush3.bf16.msra.mxu1 %v611_v8 }
  0x19   :  { %539 = vmatprep.subr.bf16.mxu0 %v646_v0  ;;  %559 = vmatprep.subr.bf16.mxu1 %v646_v0 }
  0x1c   :  { %540 = vmatpush3.bf16.msra.mxu0 %v603_v5  ;;  %560 = vmatpush3.bf16.msra.mxu1 %v612_v13 }
  0x1d   :  { %541 = vmatprep.subr.bf16.mxu0 %v646_v0  ;;  %561 = vmatprep.subr.bf16.mxu1 %v646_v0 }
  0x20   :  { %542 = vmatpush3.bf16.msra.mxu0 %v604_v7  ;;  %562 = vmatpush3.bf16.msra.mxu1 %v613_v14 }
  0x21   :  { %543 = vmatprep.subr.bf16.mxu0 %v646_v0  ;;  %563 = vmatprep.subr.bf16.mxu1 %v646_v0 }
  0x24   :  { %544 = vmatpush3.bf16.msra.mxu0 %v605_v9  ;;  %564 = vmatpush3.bf16.msra.mxu1 %v614_v15 }
  0x25   :  { %545 = vmatprep.subr.bf16.mxu0 %v646_v0  ;;  %569 = vmatprep.subr.bf16.mxu1 %v646_v0 }
  0x28   :  { %546 = vmatpush3.bf16.msra.mxu0 %v606_v10 }
  0x29   :  { %547 = vmatprep.subr.bf16.mxu0 %v646_v0 }
  0x2c   :  { %548 = vmatpush3.bf16.msra.mxu0 %v607_v11 }
  0x2d   :  { %579 = vmatprep.subr.bf16.mxu0 %v646_v0 }
  0x2f   :  { %550 = vmatmul.mubr.bf16.vlgmr.msra.gmra.mxu0 %v608_v12 }
  0x30   :  { %583 = vmatprep.mubr.msk.bf16.mxu0 %vm647_vm0, %v646_v0  ;;  %580 = vmatpush3.bf16.msra.mxu0 %v618_v39 }
  0x31   :  { %581 = vmatprep.subr.bf16.mxu0 %v646_v0 }
  0x34   :  { %582 = vmatpush3.bf16.msra.mxu0 %v619_v40 }
  0xef   :  { %v164_v17 = vpop.f32.mrf.mxu0 }
  0xf0   :  { %v165_v19 = vadd.f32 %v478_v16, %v164_v17 }
  0xf1   :  { %v551_v18 = vpop.f32.mrf.mxu0 }
  0xf2   :  { %v171_v23 = vmax.f32 %v165_v19, 0.0 }
  0xf3   :  { %v167_v20 = vpop.f32.mrf.mxu0 }
  0xf4   :  { %v168_v21 = vadd.f32 %v478_v16, %v167_v20 }
  0xf5   :  { %v552_v22 = vpop.f32.mrf.mxu0 }
  0xf6   :  { %v172_v24 = vmax.f32 %v168_v21, 0.0 }
  0xf8   :  { %v173_v25 = vpack.c.bf16 %v172_v24, %v171_v23 }
  0xfa   :  { %566 = vmatmul.mubr.msk.bf16.vlgmr.msra.gmra.mxu1 %vm215_vm1, %v173_v25 }
  0xfb   :  { %575 = vmatprep.mubr.msk.bf16.mxu1 %vm647_vm0, %v646_v0  ;;  %570 = vmatpush3.bf16.msra.mxu1 %v615_v26 }
  0xfc   :  { %571 = vmatprep.subr.bf16.mxu1 %v646_v0 }
  0xff   :  { %572 = vmatpush3.bf16.msra.mxu1 %v616_v27 }
 0x100   :  { %573 = vmatprep.subr.bf16.mxu1 %v646_v0 }
 0x103   :  { %574 = vmatpush3.bf16.msra.mxu1 %v617_v28 }
 0x104   :  { %587 = vmatprep.subr.bf16.mxu1 %v646_v0 }
 0x1ba   :  { %v253_v30 = vpop.f32.mrf.mxu1 }
 0x1bb   :  { %v254_v32 = vadd.f32 %v488_v29, %v253_v30 }
 0x1bc   :  { %v567_v31 = vpop.f32.mrf.mxu1 }
 0x1bd   :  { %v260_v36 = vmax.f32 %v254_v32, 0.0 }
 0x1be   :  { %v256_v33 = vpop.f32.mrf.mxu1 }
 0x1bf   :  { %v257_v34 = vadd.f32 %v488_v29, %v256_v33 }
 0x1c0   :  { %v568_v35 = vpop.f32.mrf.mxu1 }
 0x1c1   :  { %v261_v37 = vmax.f32 %v257_v34, 0.0 }
 0x1c3   :  { %v262_v38 = vpack.c.bf16 %v261_v37, %v260_v36 }
 0x1c5   :  { %576 = vmatmul.mubr.msk.bf16.vlgmr.msra.gmra.mxu1 %vm286_vm2, %v262_v38 }
 0x1c6   :  { %589 = vmatprep.mubr.msk.bf16.mxu1 %vm647_vm0, %v646_v0  ;;  %588 = vmatpush3.bf16.msra.mxu1 %v620_v52 }
 0x285   :  { %v324_v42 = vpop.f32.mrf.mxu1 }
 0x286   :  { %v325_v44 = vadd.f32 %v496_v41, %v324_v42 }
 0x287   :  { %v577_v43 = vpop.f32.mrf.mxu1 }
 0x288   :  { %v331_v48 = vmax.f32 %v325_v44, 0.0 }
 0x289   :  { %v327_v45 = vpop.f32.mrf.mxu1 }
 0x28a   :  { %v328_v46 = vadd.f32 %v496_v41, %v327_v45 }
 0x28b   :  { %v578_v47 = vpop.f32.mrf.mxu1 }
 0x28c   :  { %v332_v49 = vmax.f32 %v328_v46, 0.0  ;;  %462 = vrot.lane.b32.xlu1 %v328_v46, %s648_s25 }
 0x28e   :  { %v333_v50 = vpack.c.bf16 %v332_v49, %v331_v48 }
 0x290   :  { %340 = vrot.lane.b32.xlu0 %v333_v50, %s649_s26 }
 0x294   :  { %460 = vrot.lane.b32.xlu0 %v325_v44, %s648_s25 }
 0x2fe   :  { %v463_v8 = vpop.permute.xlu1 %462 }
 0x302   :  { %v341_v51 = vpop.permute.xlu0 %340 }
 0x303   :  { %584 = vmatmul.mubr.msk.bf16.vlgmr.msra.gmra.mxu0 %vm354_vm3, %v341_v51 }
 0x306   :  { %v461_v2 = vpop.permute.xlu0 %460 }
 0x3c3   :  { %v392_v54 = vpop.f32.mrf.mxu0 }
 0x3c4   :  { %v393_v56 = vadd.f32 %v501_v53, %v392_v54 }
 0x3c5   :  { %v585_v55 = vpop.f32.mrf.mxu0 }
 0x3c6   :  { %v399_v60 = vmax.f32 %v393_v56, 0.0 }
 0x3c7   :  { %v395_v57 = vpop.f32.mrf.mxu0 }
 0x3c8   :  { %v396_v58 = vadd.f32 %v501_v53, %v395_v57 }
 0x3c9   :  { %v586_v59 = vpop.f32.mrf.mxu0 }
 0x3ca   :  { %v400_v61 = vmax.f32 %v396_v58, 0.0 }
 0x3cc   :  { %v401_v62 = vpack.c.bf16 %v400_v61, %v399_v60 }
 0x3ce   :  { %590 = vmatmul.mubr.msk.bf16.vlgmr.msra.gmra.mxu1 %vm413_vm4, %v401_v62 }
 0x48e   :  { %v451_v0 = vpop.f32.mrf.mxu1 }
 0x48f   :  { %v452_v1 = vadd.f32 %v505_v63, %v451_v0 }
 0x490   :  { %v591_v3 = vpop.f32.mrf.mxu1 }
 0x491   :  { %v467_v4 = vsel %vm466_vm5, %v452_v1, %v461_v2 }
 0x492   :  { %v469_v5 = vsel %vm354_vm3, %v467_v4, 0.0  ;;  %v454_v6 = vpop.f32.mrf.mxu1 }
 0x493   :  { %471 = vst [vmem:[%s733_s3] sm:$0xff] %v469_v5  ;;  %v455_v7 = vadd.f32 %v505_v63, %v454_v6 }
 0x494   :  { %v592_v9 = vpop.f32.mrf.mxu1 }
 0x495   :  { %v468_v10 = vsel %vm466_vm5, %v455_v7, %v463_v8 }
 0x496   :  { %v470_v11 = vsel %vm354_vm3, %v468_v10, 0.0 }
 0x497   :  { %472 = vst [vmem:[%s733_s3 + $0x8] sm:$0xff] %v470_v11 }
 0x498   :  { %477 = vsyncpa [#allocation3], 1 }

</bundles_post_ra>
